<compile_context>
chip_gen: v5e
topology: v5e:2x2
jax: 0.10.0
libtpu: 0.0.40
codegen_flags: <defaults>
</compile_context>

<pallas_src>
import functools

import jax
import jax.numpy as jnp
from jax.experimental import pallas as pl
from jax.experimental.pallas import tpu as pltpu


def _round_up(a, m):
    return (a + m - 1) // m * m


def _router_body_kernel(x_ref, w1g_ref, b1g_ref, w2_ref, b2_ref, logits_t_ref, *,
                        hidden_dim, h_pad, tile_b, actual_b, mask_batch):
    """Per-batch-tile body: fused GLU projection -> ReLU -> LayerNorm -> logits^T."""
    x = x_ref[...]                                                    # [tm, d_pad] bf16

    # Fused h_layer_1 / h_layer_1_glu: one MXU pass over [d_pad, 2*h_pad]
    # (bf16 in, f32 accumulate).  h_pad % 128 == 0 -> the split below is a free
    # vreg-boundary cut, not a sub-vreg lane split.
    h12 = jnp.dot(x, w1g_ref[...], preferred_element_type=jnp.float32) + b1g_ref[...]
    h1 = h12[:, :h_pad]
    g = h12[:, h_pad:]

    # Numerically stable sigmoid; reciprocal runs on the EUP (approx) so the divide
    # stays off the VALU slots.  z = exp(-|g|) in (0, 1] -> no overflow for any g.
    z = jnp.exp(-jnp.abs(g))
    inv = pl.reciprocal(1.0 + z, approx=True)
    gate = jnp.where(g >= 0, inv, z * inv)

    # GLU then ReLU (matches the torch ordering).  Padded hidden columns are
    # exactly zero (zero weight columns, zero bias entries).
    h = jnp.maximum(h1 * gate, 0.0)

    # LayerNorm over the REAL hidden_dim (elementwise_affine=False, biased variance,
    # eps=1e-5).  Sum-based moments divided by the true H make the zero-padded
    # columns free; their (nonzero) normalized values only ever meet zero W2 rows.
    inv_h = 1.0 / hidden_dim
    mean = jnp.sum(h, axis=-1, keepdims=True) * inv_h
    mean_sq = jnp.sum(h * h, axis=-1, keepdims=True) * inv_h
    var = mean_sq - mean * mean
    hn = (h - mean) * jax.lax.rsqrt(var + 1e-5)

    # h_layer_2 in NN form (no XLU transpose of the big activation); only the tiny
    # [tm, e_pad] result is transposed before the lane-dense [e_pad, tm] store.
    logits = jnp.dot(hn.astype(jnp.bfloat16), w2_ref[...],
                     preferred_element_type=jnp.float32) + b2_ref[...]
    logits_t = jnp.transpose(logits)                                  # [e_pad, tm]

    if mask_batch:
        # Padded batch columns -> -inf so the dim-0 (batch-axis) softmax kernel can
        # consume the padded block directly without polluting the denominators.
        col = (pl.program_id(0) * tile_b
               + jax.lax.broadcasted_iota(jnp.int32, logits_t.shape, 1))
        logits_t = jnp.where(col < actual_b, logits_t, -jnp.inf)

    logits_t_ref[...] = logits_t


def _softmax_dim0_kernel(logits_t_ref, o_ref):
    """nn.Softmax(dim=0): logits are [e_pad, B] (batch on lanes) -> lane-axis softmax."""
    l = logits_t_ref[...]
    m = jnp.max(l, axis=-1, keepdims=True)
    e = jnp.exp(l - m)
    # Exact divide: this kernel is tiny and nowhere near VALU-bound, and downstream
    # routing may assume probabilities sum to exactly 1.
    o_ref[...] = e / jnp.sum(e, axis=-1, keepdims=True)


def prepare_router_weights(w1, b1, wg, bg, w2, b2):
    """Fuse/pad/cast the weights. For inference with static weights, hoist this out
    of the per-call path so the concatenation / padding happens once."""
    d_in, hidden = w1.shape
    num_experts = w2.shape[1]
    d_pad = _round_up(d_in, 128)
    h_pad = _round_up(hidden, 128)
    e_pad = _round_up(num_experts, 8)

    def pad2(a, rows, cols):
        return jnp.pad(a, ((0, rows - a.shape[0]), (0, cols - a.shape[1])))

    w1g = jnp.concatenate([pad2(w1, d_pad, h_pad), pad2(wg, d_pad, h_pad)],
                          axis=1).astype(jnp.bfloat16)                   # [d_pad, 2*h_pad]
    b1g = jnp.concatenate([pad2(b1, 1, h_pad), pad2(bg, 1, h_pad)],
                          axis=1).astype(jnp.float32)                    # [1, 2*h_pad]
    w2p = pad2(w2, h_pad, e_pad).astype(jnp.bfloat16)                    # [h_pad, e_pad]
    b2p = pad2(b2.reshape(1, num_experts), 1, e_pad).astype(jnp.float32)  # [1, e_pad]
    dims = (d_in, hidden, num_experts, d_pad, h_pad, e_pad)
    return (w1g, b1g, w2p, b2p), dims


def router_with_glu(x, w1, b1, wg, bg, w2, b2, *, block_b=512):
    """glu_on=True forward.  w* are [in, out], b* are [1, out].  Returns [B, E] f32."""
    (w1g, b1g, w2p, b2p), (d_in, hidden, num_experts, d_pad, h_pad, e_pad) = \
        prepare_router_weights(w1, b1, wg, bg, w2, b2)

    B = x.shape[0]

    # --- batch tiling ------------------------------------------------------------
    if B <= 128:
        tile_b, padded_b = B, B           # single tile == full dim (any B allowed)
    else:
        pb = _round_up(B, 128)
        # >= 2 grid steps so the "parallel" batch axis shards across both v7x TCs;
        # tiles stay multiples of 128 (lane-dense [e_pad, tile_b] store) and are
        # capped at block_b so the per-tile working set fits v7x's 64 MiB VMEM.
        tile_b = min(block_b, max(128, _round_up(pl.cdiv(pb, 2), 128)))
        padded_b = _round_up(pb, tile_b)
    grid = (padded_b // tile_b,)
    mask_batch = padded_b != B

    xp = x
    if d_pad != d_in or padded_b != B:
        xp = jnp.pad(x, ((0, padded_b - B), (0, d_pad - d_in)))
    xp = xp.astype(jnp.bfloat16)

    # --- explicit VMEM budget (valid even on v7x's 64 MiB physical VMEM) ----------
    vmem_bytes = (
        2 * tile_b * d_pad * 2           # x tile, double-buffered, bf16
        + d_pad * 2 * h_pad * 2          # fused W1|Wg, single-buffered, bf16
        + 2 * h_pad * 4                  # fused bias, f32
        + h_pad * e_pad * 2              # W2, bf16
        + e_pad * 4                      # b2, f32
        + 2 * e_pad * tile_b * 4         # logits^T out tile, double-buffered, f32
        + 6 * tile_b * h_pad * 4         # live f32 intermediates (h12 halves, gate, h, hn)
    )
    vmem_limit = int(min(64 * 1024 * 1024, max(32 * 1024 * 1024, 2 * vmem_bytes)))

    pinned = dict(pipeline_mode=pl.Buffered(1))   # constant index_map -> one buffer

    logits_t = pl.pallas_call(
        functools.partial(
            _router_body_kernel,
            hidden_dim=hidden, h_pad=h_pad, tile_b=tile_b,
            actual_b=B, mask_batch=mask_batch),
        out_shape=jax.ShapeDtypeStruct((e_pad, padded_b), jnp.float32),
        grid_spec=pltpu.PrefetchScalarGridSpec(
            num_scalar_prefetch=0,
            grid=grid,
            in_specs=[
                pl.BlockSpec((tile_b, d_pad), lambda i: (i, 0)),               # x tile
                pl.BlockSpec((d_pad, 2 * h_pad), lambda i: (0, 0), **pinned),  # W1|Wg
                pl.BlockSpec((1, 2 * h_pad), lambda i: (0, 0), **pinned),      # b1|bg
                pl.BlockSpec((h_pad, e_pad), lambda i: (0, 0), **pinned),      # W2
                pl.BlockSpec((1, e_pad), lambda i: (0, 0), **pinned),          # b2
            ],
            out_specs=pl.BlockSpec((e_pad, tile_b), lambda i: (0, i)),
        ),
        compiler_params=pltpu.CompilerParams(
            dimension_semantics=("parallel",),
            vmem_limit_bytes=vmem_limit,
        ),
    )(xp, w1g, b1g, w2p, b2p)

    # Second pass: softmax over the batch (lane) axis.  It couples every batch row,
    # so it cannot live inside the B-tiled grid.  Padded columns are already -inf,
    # so no slice/copy is needed before it.  e_pad * padded_b f32 is tiny for
    # realistic router sizes -> one whole-array VMEM block.
    vmem_spec = pl.BlockSpec(memory_space=pltpu.MemorySpace.VMEM)
    probs_t = pl.pallas_call(
        _softmax_dim0_kernel,
        out_shape=jax.ShapeDtypeStruct((e_pad, padded_b), jnp.float32),
        in_specs=[vmem_spec],
        out_specs=vmem_spec,
    )(logits_t)

    # Transpose back to [B, E] and drop padding (fuses into one XLA copy).
    return jnp.transpose(probs_t)[:B, :num_experts]


def _reference(x, w1, b1, wg, bg, w2, b2):
    h1 = x @ w1 + b1
    gate = jax.nn.sigmoid(x @ wg + bg)
    h = jnp.maximum(h1 * gate, 0.0)
    mean = jnp.mean(h, axis=-1, keepdims=True)
    var = jnp.mean((h - mean) ** 2, axis=-1, keepdims=True)
    h = (h - mean) / jnp.sqrt(var + 1e-5)
    logits = h @ w2 + b2
    return jax.nn.softmax(logits, axis=0)


if __name__ == "__main__":
    # Small shapes consistent with the module: tokens=8, input_dim=32,
    # hidden_dim=32, num_experts=4, glu_on=True.
    B, D_IN, H, E = 8, 32, 32, 4

    key = jax.random.PRNGKey(0)
    kx, k1, kb1, kg, kbg, k2, kb2 = jax.random.split(key, 7)

    x = jax.random.normal(kx, (B, D_IN), dtype=jnp.float32)

    def uinit(k, shape, fan_in):
        bound = 1.0 / (fan_in ** 0.5)
        return jax.random.uniform(k, shape, jnp.float32, -bound, bound)

    w1 = uinit(k1, (D_IN, H), D_IN)
    b1 = uinit(kb1, (1, H), D_IN)
    wg = uinit(kg, (D_IN, H), D_IN)
    bg = uinit(kbg, (1, H), D_IN)
    w2 = uinit(k2, (H, E), H)
    b2 = uinit(kb2, (1, E), H)

    out = router_with_glu(x, w1, b1, wg, bg, w2, b2)
    out = jax.block_until_ready(out)

    ref = _reference(x, w1, b1, wg, bg, w2, b2)
    assert out.shape == (B, E)
    # bf16 MXU inputs (f32 accumulation) + approx EUP reciprocal in the sigmoid:
    # compare with a correspondingly widened tolerance.
    assert jnp.allclose(out, ref, atol=2e-2, rtol=2e-2), "mismatch vs JAX reference"
    # Softmax over dim 0 with an exact divide -> every expert column sums to 1.
    assert jnp.allclose(jnp.sum(out, axis=0), jnp.ones((E,)), atol=1e-3)

    print("KERNEL_OK")
</pallas_src>

<mosaic_0001>
module attributes {stable_mosaic.version = 11 : i64} {
  func.func @_router_body_kernel(%arg0: i32, %arg1: memref<8x128xbf16, #tpu.memory_space<vmem>>, %arg2: memref<128x256xbf16, #tpu.memory_space<vmem>>, %arg3: memref<1x256xf32, #tpu.memory_space<vmem>>, %arg4: memref<128x8xbf16, #tpu.memory_space<vmem>>, %arg5: memref<1x8xf32, #tpu.memory_space<vmem>>, %arg6: memref<8x8xf32, #tpu.memory_space<vmem>>) attributes {dimension_semantics = [#tpu.dimension_semantics<parallel>], iteration_bounds = array<i64: 1>, scalar_prefetch = 0 : i64, scratch_operands = 0 : i64, tpu.core_type = #tpu.core_type<tc>, window_params = [{transform_indices = @transform_0, window_bounds = array<i64: 8, 128>}, {pipeline_mode = #tpu.pipeline_mode<synchronous>, transform_indices = @transform_1, window_bounds = array<i64: 128, 256>}, {pipeline_mode = #tpu.pipeline_mode<synchronous>, transform_indices = @transform_2, window_bounds = array<i64: 1, 256>}, {pipeline_mode = #tpu.pipeline_mode<synchronous>, transform_indices = @transform_3, window_bounds = array<i64: 128, 8>}, {pipeline_mode = #tpu.pipeline_mode<synchronous>, transform_indices = @transform_4, window_bounds = array<i64: 1, 8>}, {transform_indices = @transform_5, window_bounds = array<i64: 8, 8>}]} {
    %c0 = arith.constant 0 : index
    %c0_0 = arith.constant 0 : index
    %0 = vector.load %arg1[%c0, %c0_0] : memref<8x128xbf16, #tpu.memory_space<vmem>>, vector<8x128xbf16>
    %c0_1 = arith.constant 0 : index
    %c0_2 = arith.constant 0 : index
    %1 = vector.load %arg2[%c0_1, %c0_2] : memref<128x256xbf16, #tpu.memory_space<vmem>>, vector<128x256xbf16>
    %cst = arith.constant dense<0.000000e+00> : vector<8x256xf32>
    %2 = tpu.matmul %0, %1, %cst {dimension_numbers = #tpu.dot_dimension_numbers<[1], [0], [0], [1], [0, 0, 1, 1], [], []>} : vector<8x128xbf16>, vector<128x256xbf16>, vector<8x256xf32> -> vector<8x256xf32>
    %c0_3 = arith.constant 0 : index
    %c0_4 = arith.constant 0 : index
    %3 = vector.load %arg3[%c0_3, %c0_4] : memref<1x256xf32, #tpu.memory_space<vmem>>, vector<1x256xf32>
    %4 = vector.broadcast %3 : vector<1x256xf32> to vector<8x256xf32>
    %5 = arith.addf %2, %4 : vector<8x256xf32>
    %6 = vector.extract_strided_slice %5 {offsets = [0, 0], sizes = [8, 128], strides = [1, 1]} : vector<8x256xf32> to vector<8x128xf32>
    %7 = vector.extract_strided_slice %5 {offsets = [0, 128], sizes = [8, 128], strides = [1, 1]} : vector<8x256xf32> to vector<8x128xf32>
    %8 = math.absf %7 : vector<8x128xf32>
    %cst_5 = arith.constant 0.000000e+00 : f32
    %9 = vector.broadcast %cst_5 : f32 to vector<8x128xf32>
    %10 = arith.subf %9, %8 : vector<8x128xf32>
    %11 = math.exp %10 : vector<8x128xf32>
    %cst_6 = arith.constant 1.000000e+00 : f32
    %12 = vector.broadcast %cst_6 : f32 to vector<8x128xf32>
    %13 = arith.addf %12, %11 : vector<8x128xf32>
    %14 = tpu.reciprocal %13 {approx = true} : vector<8x128xf32> -> vector<8x128xf32>
    %cst_7 = arith.constant 0.000000e+00 : f32
    %15 = vector.broadcast %cst_7 : f32 to vector<8x128xf32>
    %16 = arith.cmpf oge, %7, %15 : vector<8x128xf32>
    %17 = arith.mulf %11, %14 : vector<8x128xf32>
    %18 = arith.select %16, %14, %17 : vector<8x128xi1>, vector<8x128xf32>
    %19 = arith.mulf %6, %18 : vector<8x128xf32>
    %cst_8 = arith.constant 0.000000e+00 : f32
    %20 = vector.broadcast %cst_8 : f32 to vector<8x128xf32>
    %21 = arith.maximumf %19, %20 : vector<8x128xf32>
    %cst_9 = arith.constant dense<0.000000e+00> : vector<8xf32>
    %22 = vector.multi_reduction <add>, %21, %cst_9 [1] : vector<8x128xf32> to vector<8xf32>
    %23 = vector.shape_cast %22 : vector<8xf32> to vector<8x1xf32>
    %cst_10 = arith.constant 3.125000e-02 : f32
    %24 = vector.broadcast %cst_10 : f32 to vector<8x1xf32>
    %25 = arith.mulf %23, %24 : vector<8x1xf32>
    %26 = arith.mulf %21, %21 : vector<8x128xf32>
    %cst_11 = arith.constant dense<0.000000e+00> : vector<8xf32>
    %27 = vector.multi_reduction <add>, %26, %cst_11 [1] : vector<8x128xf32> to vector<8xf32>
    %28 = vector.shape_cast %27 : vector<8xf32> to vector<8x1xf32>
    %cst_12 = arith.constant 3.125000e-02 : f32
    %29 = vector.broadcast %cst_12 : f32 to vector<8x1xf32>
    %30 = arith.mulf %28, %29 : vector<8x1xf32>
    %31 = arith.mulf %25, %25 : vector<8x1xf32>
    %32 = arith.subf %30, %31 : vector<8x1xf32>
    %33 = vector.broadcast %25 : vector<8x1xf32> to vector<8x128xf32>
    %34 = arith.subf %21, %33 : vector<8x128xf32>
    %cst_13 = arith.constant 9.99999974E-6 : f32
    %35 = vector.broadcast %cst_13 : f32 to vector<8x1xf32>
    %36 = arith.addf %32, %35 : vector<8x1xf32>
    %37 = math.rsqrt %36 : vector<8x1xf32>
    %38 = vector.broadcast %37 : vector<8x1xf32> to vector<8x128xf32>
    %39 = arith.mulf %34, %38 : vector<8x128xf32>
    %40 = arith.truncf %39 : vector<8x128xf32> to vector<8x128xbf16>
    %c0_14 = arith.constant 0 : index
    %c0_15 = arith.constant 0 : index
    %41 = vector.load %arg4[%c0_14, %c0_15] : memref<128x8xbf16, #tpu.memory_space<vmem>>, vector<128x8xbf16>
    %cst_16 = arith.constant dense<0.000000e+00> : vector<8x8xf32>
    %42 = tpu.matmul %40, %41, %cst_16 {dimension_numbers = #tpu.dot_dimension_numbers<[1], [0], [0], [1], [0, 0, 1, 1], [], []>} : vector<8x128xbf16>, vector<128x8xbf16>, vector<8x8xf32> -> vector<8x8xf32>
    %c0_17 = arith.constant 0 : index
    %c0_18 = arith.constant 0 : index
    %43 = vector.load %arg5[%c0_17, %c0_18] : memref<1x8xf32, #tpu.memory_space<vmem>>, vector<1x8xf32>
    %44 = vector.broadcast %43 : vector<1x8xf32> to vector<8x8xf32>
    %45 = arith.addf %42, %44 : vector<8x8xf32>
    %46 = tpu.transpose %45, [1, 0] : vector<8x8xf32> -> vector<8x8xf32>
    %c0_19 = arith.constant 0 : index
    %c0_20 = arith.constant 0 : index
    %47 = vector.load %arg6[%c0_19, %c0_20] : memref<8x8xf32, #tpu.memory_space<vmem>>, vector<8x8xf32>
    tpu.vector_store %arg6[%c0_19, %c0_20], %46 {strides = array<i32>} : memref<8x8xf32, #tpu.memory_space<vmem>>, vector<8x8xf32>,
    return
  }
  func.func @transform_0(%arg0: i32) -> (i32, i32) {
    %c0_i32 = arith.constant 0 : i32
    %c0_i32_0 = arith.constant 0 : i32
    return %arg0, %c0_i32 : i32, i32
  }
  func.func @transform_1(%arg0: i32) -> (i32, i32) {
    %c0_i32 = arith.constant 0 : i32
    %c0_i32_0 = arith.constant 0 : i32
    %c0_i32_1 = arith.constant 0 : i32
    return %c0_i32, %c0_i32_0 : i32, i32
  }
  func.func @transform_2(%arg0: i32) -> (i32, i32) {
    %c0_i32 = arith.constant 0 : i32
    %c0_i32_0 = arith.constant 0 : i32
    %c0_i32_1 = arith.constant 0 : i32
    return %c0_i32, %c0_i32_0 : i32, i32
  }
  func.func @transform_3(%arg0: i32) -> (i32, i32) {
    %c0_i32 = arith.constant 0 : i32
    %c0_i32_0 = arith.constant 0 : i32
    %c0_i32_1 = arith.constant 0 : i32
    return %c0_i32, %c0_i32_0 : i32, i32
  }
  func.func @transform_4(%arg0: i32) -> (i32, i32) {
    %c0_i32 = arith.constant 0 : i32
    %c0_i32_0 = arith.constant 0 : i32
    %c0_i32_1 = arith.constant 0 : i32
    return %c0_i32, %c0_i32_0 : i32, i32
  }
  func.func @transform_5(%arg0: i32) -> (i32, i32) {
    %c0_i32 = arith.constant 0 : i32
    %c0_i32_0 = arith.constant 0 : i32
    return %c0_i32, %arg0 : i32, i32
  }
}

</mosaic_0001>

<bundles_post_ra>
// kernel: tpu_custom_call.1
= control target key start
LH: loop header
LB: loop body
LE: loop exit
PB: predicated region body
PF: predicated region fallthrough
CT: control target
= control target key end

     0   :  { %10 = vsyncpa [#allocation3], 0  ;;  %s589_s0 = inlined_call_operand.vmem [shape: bf16[8,128], index: 0, kind: input, shape index: {}]   ;;  %s590_s1 = inlined_call_operand.hbm [shape: bf16[128,256], index: 1, kind: input, shape index: {}]   ;;  %s591_s2 = inlined_call_operand.vmem [shape: f32[1,256], index: 2, kind: input, shape index: {}]   ;;  %s592_s3 = inlined_call_operand.vmem [shape: bf16[128,8], index: 3, kind: input, shape index: {}]   ;;  %s593_s4 = inlined_call_operand.vmem [shape: f32[1,8], index: 4, kind: input, shape index: {}]   ;;  %s594_s5 = inlined_call_operand.hbm [shape: f32[8,8], index: 5, kind: output, shape index: {}]  }
   0x1   :  { %11 = vsyncpa [#allocation4], 0  ;;  %s18_s20 = sshll.u32 %s590_s1, 4  ;;  %s516_s21 = smov [#allocation2]   ;;  %s19_s20 = int_to_ptr.hbm [resolvable:$true] %s18_s20 }
   0x2   :  { %s20_s22 = sshll.u32 %s516_s21, 4  ;;  %s517_s23 = smov 128   ;;  %s21_s22 = int_to_ptr.vmem [resolvable:$true] %s20_s22 }
   0x3   :  { %s518_s24 = smov 8  }
   0x4   :  { %26 = dma.hbm_to_vmem [thread:$0]  %s19_s20, 2048, %s21_s22, [#allocation3], %s517_s23, %s517_s23, %s518_s24  }
   0x5   :  { %512 = dma.done.wait [#allocation3], 2048  }
   0x6   :  { %513 = vsyncadd [#allocation3], 4294965248  ;;  %v442_v0 = vld [vmem:[#allocation2 + $0x74] sm:$0xf]  ;;  %v392_v1 = vld [vmem:[#allocation2 + $0x78] sm:$0xf0] }
   0x7   :  { %v440_v2 = vld [vmem:[#allocation2 + $0x64] sm:$0xf]  ;;  %v395_v3 = vor.u32 %v442_v0, %v392_v1  ;;  %v384_v4 = vld [vmem:[#allocation2 + $0x68] sm:$0xf0]  ;;  %v390_v6 = vld [vmem:[#allocation2 + $0x70] sm:$0xf] }
   0x8   :  { %v387_v5 = vor.u32 %v440_v2, %v384_v4  ;;  %v443_v7 = vld [vmem:[#allocation2 + $0x74] sm:$0xf0]  ;;  %v438_v8 = vld [vmem:[#allocation2 + $0x54] sm:$0xf]  ;;  %v376_v9 = vld [vmem:[#allocation2 + $0x58] sm:$0xf0] }
   0x9   :  { %153 = vmatpush.bf16.msra.mxu1 %v395_v3  ;;  %v391_v10 = vor.u32 %v443_v7, %v390_v6  ;;  %v382_v11 = vld [vmem:[#allocation2 + $0x60] sm:$0xf]  ;;  %v441_v12 = vld [vmem:[#allocation2 + $0x64] sm:$0xf0]  ;;  %v379_v14 = vor.u32 %v438_v8, %v376_v9  ;;  %v374_v15 = vld [vmem:[#allocation2 + $0x50] sm:$0xf] }
   0xa   :  { %v383_v13 = vor.u32 %v441_v12, %v382_v11  ;;  %v439_v16 = vld [vmem:[#allocation2 + $0x54] sm:$0xf0]  ;;  %v436_v17 = vld [vmem:[#allocation2 + $0x44] sm:$0xf]  ;;  %v368_v18 = vld [vmem:[#allocation2 + $0x48] sm:$0xf0] }
   0xb   :  { %140 = vmatpush.bf16.msra.mxu0 %v391_v10  ;;  %v375_v19 = vor.u32 %v439_v16, %v374_v15  ;;  %v371_v20 = vor.u32 %v436_v17, %v368_v18  ;;  %v366_v21 = vld [vmem:[#allocation2 + $0x40] sm:$0xf]  ;;  %v437_v22 = vld [vmem:[#allocation2 + $0x44] sm:$0xf0]  ;;  %v434_v23 = vld [vmem:[#allocation2 + $0x34] sm:$0xf] }
   0xc   :  { %v360_v24 = vld [vmem:[#allocation2 + $0x38] sm:$0xf0]  ;;  %v367_v25 = vor.u32 %v437_v22, %v366_v21  ;;  %v358_v27 = vld [vmem:[#allocation2 + $0x30] sm:$0xf]  ;;  %v435_v28 = vld [vmem:[#allocation2 + $0x34] sm:$0xf0] }
   0xd   :  { %154 = vmatpush.bf16.msra.mxu1 %v387_v5  ;;  %v363_v26 = vor.u32 %v434_v23, %v360_v24  ;;  %v432_v29 = vld [vmem:[#allocation2 + $0x24] sm:$0xf]  ;;  %v352_v30 = vld [vmem:[#allocation2 + $0x28] sm:$0xf0]  ;;  %v359_v31 = vor.u32 %v435_v28, %v358_v27  ;;  %v350_v33 = vld [vmem:[#allocation2 + $0x20] sm:$0xf] }
   0xe   :  { %v355_v32 = vor.u32 %v432_v29, %v352_v30  ;;  %v433_v34 = vld [vmem:[#allocation2 + $0x24] sm:$0xf0]  ;;  %v430_v35 = vld [vmem:[#allocation2 + $0x14] sm:$0xf]  ;;  %v344_v36 = vld [vmem:[#allocation2 + $0x18] sm:$0xf0] }
   0xf   :  { %141 = vmatpush.bf16.msra.mxu0 %v383_v13  ;;  %v351_v37 = vor.u32 %v433_v34, %v350_v33  ;;  %v347_v38 = vor.u32 %v430_v35, %v344_v36  ;;  %v342_v39 = vld [vmem:[#allocation2 + $0x10] sm:$0xf]  ;;  %v431_v40 = vld [vmem:[#allocation2 + $0x14] sm:$0xf0]  ;;  %v428_v41 = vld [vmem:[#allocation2 + $0x4] sm:$0xf] }
  0x10   :  { %v336_v42 = vld [vmem:[#allocation2 + $0x8] sm:$0xf0]  ;;  %v343_v43 = vor.u32 %v431_v40, %v342_v39  ;;  %v334_v45 = vld [vmem:[#allocation2] sm:$0xf]  ;;  %v429_v46 = vld [vmem:[#allocation2 + $0x4] sm:$0xf0] }
  0x11   :  { %155 = vmatpush.bf16.msra.mxu1 %v379_v14  ;;  %v339_v44 = vor.u32 %v428_v41, %v336_v42  ;;  %v335_v47 = vor.u32 %v429_v46, %v334_v45  ;;  %v37_v48 = vld [vmem:[%s589_s0] sm:$0xf]  ;;  %v451_v5 = vld [vmem:[%s592_s3 + $0x38] sm:$0xff]  ;;  %v450_v6 = vld [vmem:[%s592_s3 + $0x30] sm:$0xff]  ;;  %s519_s18 = smov [#allocation5]   ;;  %s322_s22 = sshll.u32 %s594_s5, 4  ;;  %s323_s22 = int_to_ptr.hbm [resolvable:$true] %s322_s22 }
  0x12   :  { %v54_v49 = vld [vmem:[%s591_s2] sm:$0x3]  ;;  %268 = vmatpush.bf16.msra.mxu2 %v451_v5  ;;  %v449_v7 = vld [vmem:[%s592_s3 + $0x28] sm:$0xff]  ;;  %v447_v9 = vld [vmem:[%s592_s3 + $0x18] sm:$0xff]  ;;  %s320_s19 = sshll.u32 %s519_s18, 4  ;;  %vm313_vm4 = vcmask 64512   ;;  %s321_s19 = int_to_ptr.vmem [resolvable:$true] %s320_s19 }
  0x13   :  { %142 = vmatpush.bf16.msra.mxu0 %v375_v19  ;;  %v57_v50 = vperm.slane %v54_v49, 1  ;;  %v56_v61 = vperm.slane %v54_v49, 0  ;;  %v448_v8 = vld [vmem:[%s592_s3 + $0x20] sm:$0xff]  ;;  %v446_v10 = vld [vmem:[%s592_s3 + $0x10] sm:$0xff]  ;;  %v445_v11 = vld [vmem:[%s592_s3 + $0x8] sm:$0xff] }
  0x14   :  { %v444_v12 = vld [vmem:[%s592_s3] sm:$0xff] }
  0x15   :  { %156 = vmatpush.bf16.msra.mxu1 %v371_v20  ;;  %v457_v30 = vld [vmem:[%s593_s4] ss:$0 sm:$0xff] }
  0x16   :  { %269 = vmatpush.bf16.msra.mxu2 %v450_v6 }
  0x17   :  { %143 = vmatpush.bf16.msra.mxu0 %v367_v25 }
  0x19   :  { %157 = vmatpush.bf16.msra.mxu1 %v363_v26 }
  0x1a   :  { %270 = vmatpush.bf16.msra.mxu2 %v449_v7 }
  0x1b   :  { %144 = vmatpush.bf16.msra.mxu0 %v359_v31 }
  0x1d   :  { %158 = vmatpush.bf16.msra.mxu1 %v355_v32 }
  0x1e   :  { %271 = vmatpush.bf16.msra.mxu2 %v448_v8 }
  0x1f   :  { %145 = vmatpush.bf16.msra.mxu0 %v351_v37 }
  0x21   :  { %159 = vmatpush.bf16.msra.mxu1 %v347_v38 }
  0x22   :  { %272 = vmatpush.bf16.msra.mxu2 %v447_v9 }
  0x23   :  { %146 = vmatpush.bf16.msra.mxu0 %v343_v43 }
  0x25   :  { %160 = vmatpush.bf16.msra.mxu1 %v339_v44 }
  0x26   :  { %273 = vmatpush.bf16.msra.mxu2 %v446_v10 }
  0x27   :  { %147 = vmatpush.bf16.msra.mxu0 %v335_v47 }
  0x28   :  { %161 = vmatmul.bf16.vlgmr.msra.gmra.mxu1 %v37_v48 }
  0x2a   :  { %148 = vmatmul.bf16.vlgmr.msra.gmra.mxu0 %v37_v48  ;;  %274 = vmatpush.bf16.msra.mxu2 %v445_v11 }
  0x2e   :  { %275 = vmatpush.bf16.msra.mxu2 %v444_v12 }
  0xa5   :  { %v162_v51 = vpop.f32.mrf.mxu1 }
  0xa6   :  { %v163_v52 = vadd.f32 %v162_v51, %v57_v50 }
  0xa7   :  { %v149_v54 = vpop.f32.mrf.mxu0 }
  0xa8   :  { %v166_v53 = vand.u32 2147483647, %v163_v52  ;;  %v150_v63 = vadd.f32 %v149_v54, %v56_v61  ;;  %vm172_vm0 = vcmp.ge.f32.partialorder %v163_v52, 0.0 }
  0xaa   :  { %v167_v55 = vsub.f32 0.0, %v166_v53 }
  0xac   :  { %v168_v56 = vmul.f32 1.442695, %v167_v55 }
  0xad   :  { %v164_v57 = vpop.f32.mrf.mxu1 }
  0xae   :  { %458 = vpow2.f32 %v168_v56 }
  0xaf   :  { %v151_v58 = vpop.f32.mrf.mxu0 }
  0xb4   :  { %v459_v59 = vpop.eup %458 }
  0xb5   :  { %v170_v60 = vadd.f32 1.0, %v459_v59 }
  0xb7   :  { %460 = vrcp.f32 %v170_v60 }
  0xbd   :  { %v461_v62 = vpop.eup %460 }
  0xbe   :  { %v173_v0 = vmul.f32 %v461_v62, %v459_v59 }
  0xc0   :  { %v174_v1 = vsel %vm172_vm0, %v461_v62, %v173_v0 }
  0xc1   :  { %v175_v2 = vmul.f32 %v174_v1, %v150_v63 }
  0xc3   :  { %v176_v3 = vmax.f32 %v175_v2, 0.0 }
  0xc5   :  { %177 = vadd.xlane.f32.xlu0 %v176_v3  ;;  %v180_v4 = vmul.f32 %v176_v3, %v176_v3 }
  0xcd   :  { %181 = vadd.xlane.f32.xlu0 %v180_v4 }
 0x138   :  { %v178_v13 = vpop.xlane.xlu0 %177 }
 0x139   :  { %v179_v14 = vmul.f32 0.03125, %v178_v13 }
 0x13b   :  { %v184_v16 = vmul.f32 %v179_v14, %v179_v14  ;;  %v186_v26 = vsub.f32 %v176_v3, %v179_v14 }
 0x140   :  { %v182_v15 = vpop.xlane.xlu0 %181 }
 0x141   :  { %v183_v17 = vmul.f32 0.03125, %v182_v15 }
 0x143   :  { %v185_v18 = vsub.f32 %v183_v17, %v184_v16 }
 0x145   :  { %v187_v19 = vadd.f32 1e-05, %v185_v18 }
 0x147   :  { %462 = vrsqrt.f32 %v187_v19  ;;  %vm194_vm2 = vweird.f32 %v187_v19 }
 0x14d   :  { %v463_v20 = vpop.eup %462 }
 0x14e   :  { %v189_v21 = vmul.f32 %v463_v20, %v187_v19  ;;  %vm195_vm1 = vweird.f32 %v463_v20 }
 0x14f   :  { %vm196_vm3 = vmor %vm194_vm2, %vm195_vm1 }
 0x150   :  { %v190_v22 = vmul.f32 %v463_v20, %v189_v21 }
 0x152   :  { %v191_v23 = vmul.f32 0.5, %v190_v22 }
 0x154   :  { %v192_v24 = vsub.f32 1.5, %v191_v23 }
 0x156   :  { %v193_v25 = vmul.f32 %v463_v20, %v192_v24 }
 0x158   :  { %v197_v27 = vsel %vm196_vm3, %v463_v20, %v193_v25 }
 0x159   :  { %v198_v28 = vmul.f32 %v197_v27, %v186_v26 }
 0x15b   :  { %v199_v29 = vpack.c.bf16 %v198_v28, %v198_v28 }
 0x15d   :  { %276 = vmatmul.bf16.vlgmr.msra.gmra.mxu2 %v199_v29 }
 0x1e0   :  { %v277_v31 = vpop.f32.mrf.mxu2 }
 0x1e1   :  { %v278_v32 = vadd.f32 %v457_v30, %v277_v31 }
 0x1e3   :  { %281 = vxpose.xlu1.b32.start.end [1/1] (short) (narrow) %v278_v32, 8 }
 0x1e8   :  { %v279_v33 = vpop.f32.mrf.mxu2 }
 0x287   :  { %v297_v34 = vpop.trf.xlu1 }
 0x288   :  { %314 = vst.msk [vmem:[#allocation5] sm:$0xff] %vm313_vm4, %v297_v34 }
 0x289   :  { %325 = dma.vmem_to_hbm [thread:$0]  %s321_s19, 128, %s323_s22, [#allocation4]  }
 0x28a   :  { %514 = dma.done.wait [#allocation4], 128  }
 0x28b   :  { %515 = vsyncadd [#allocation4], 4294967168 }
 0x28c   :  { %330 = vsyncpa [#allocation3], 1 }
 0x28d   :  { %331 = vsyncpa [#allocation4], 1 }

</bundles_post_ra>
